<compile_context>
chip_gen: v7x
topology: tpu7x:2x2x1
jax: 0.10.0
libtpu: 0.0.40
codegen_flags: <defaults>
</compile_context>

<pallas_src>
import jax
import jax.numpy as jnp
from jax.experimental import pallas as pl
from jax.experimental.pallas import tpu as pltpu


def _round_up(x, m):
    return ((x + m - 1) // m) * m


def critic_kernel(s_ref, a_ref, w1s_ref, w1a_ref, b1_ref, w2_ref, b2_ref,
                  w3t_ref, b3_ref, o_ref):
    # Layer 1: Linear(concat(state, action)) + ReLU, expressed as two matmuls
    # against the row-split weight so the concat never materializes and the
    # MXU pads the small K dims (n_obs / n_actions) in-register.
    h1 = jnp.dot(s_ref[...], w1s_ref[...], preferred_element_type=jnp.float32)
    h1 = h1 + jnp.dot(a_ref[...], w1a_ref[...],
                      preferred_element_type=jnp.float32)
    h1 = jnp.maximum(h1 + b1_ref[...], 0.0)

    # Layer 2: Linear + ReLU (f32 accumulation on the MXU; f32 epilogue).
    h2 = jnp.dot(h1.astype(w2_ref.dtype), w2_ref[...],
                 preferred_element_type=jnp.float32)
    h2 = jnp.maximum(h2 + b2_ref[...], 0.0)

    # Layer 3: hidden -> 1.  An MXU matmul here would waste 127/128 output
    # columns; a broadcast multiply + lane reduction (VPU + XLU) is cheaper
    # and lets us store a (TB, 1) result directly.  No final activation.
    q = jnp.sum(h2 * w3t_ref[...], axis=-1, keepdims=True)
    o_ref[...] = (q + b3_ref[...]).astype(o_ref.dtype)


def prepare_params(params, n_obs, compute_dtype=jnp.float32):
    """Pad / split / transpose / cast the Critic parameters ONCE (hoisted out
    of the per-call path).  Padded weight cols and bias entries are zero and
    therefore inert through Linear + ReLU."""
    w1, b1, w2, b2, w3, b3 = (params[k] for k in ("w1", "b1", "w2", "b2",
                                                  "w3", "b3"))
    n_in, hidden = w1.shape
    n_act = n_in - n_obs

    # v6e/v7x MXU is 256x256: round hidden to 256 when already >=256,
    # otherwise 128 (padding tiny hidden to 256 costs more than it saves).
    H = _round_up(hidden, 256 if hidden >= 256 else 128)

    w1s = jnp.zeros((n_obs, H), compute_dtype)
    w1s = w1s.at[:, :hidden].set(w1[:n_obs].astype(compute_dtype))
    w1a = jnp.zeros((n_act, H), compute_dtype)
    w1a = w1a.at[:, :hidden].set(w1[n_obs:].astype(compute_dtype))
    w2p = jnp.zeros((H, H), compute_dtype)
    w2p = w2p.at[:hidden, :hidden].set(w2.astype(compute_dtype))
    # Biases and the (1, H) row-vector form of w3 stay f32 (f32 epilogue /
    # VPU reduction — also keeps v5e, which has no bf16 VPU, happy).
    b1p = jnp.zeros((1, H), jnp.float32).at[:, :hidden].set(b1.astype(jnp.float32))
    b2p = jnp.zeros((1, H), jnp.float32).at[:, :hidden].set(b2.astype(jnp.float32))
    w3t = jnp.zeros((1, H), jnp.float32).at[:, :hidden].set(
        w3.T.astype(jnp.float32))
    b3p = b3.astype(jnp.float32).reshape(1, 1)

    return {
        "w1s": w1s, "w1a": w1a, "b1": b1p, "w2": w2p, "b2": b2p,
        "w3t": w3t, "b3": b3p,
        "n_obs": n_obs, "n_act": n_act, "hidden": hidden, "H": H,
        "dtype": compute_dtype,
    }


def critic_forward(state, action, prep):
    """state: [batch, n_obs], action: [batch, n_actions]; returns [batch, 1]."""
    batch = state.shape[0]
    n_obs, n_act, H = prep["n_obs"], prep["n_act"], prep["H"]
    dtype = prep["dtype"]

    # Batch tile: multiple of 8 (f32 sublane), large enough to amortize the
    # ~0.35us per-grid-step overhead, but capped so the grid has >= 2 steps
    # once batch >= 16 (keeps both v7x TensorCores busy).  At most one
    # partial (zero-padded) tile.
    TB = min(_round_up(batch, 8), 1024)
    if batch >= 16:
        TB = min(TB, _round_up(pl.cdiv(_round_up(batch, 8), 2), 8))
    BP = _round_up(batch, TB)

    sp = state.astype(dtype)
    ap = action.astype(dtype)
    if BP != batch:
        sp = jnp.pad(sp, ((0, BP - batch), (0, 0)))
        ap = jnp.pad(ap, ((0, BP - batch), (0, 0)))

    grid = (BP // TB,)

    # Weights/biases: constant block index -> resident in VMEM, DMA'd once.
    # (For very large hidden on v7x, bf16 weights keep this under the 64 MiB
    # VMEM budget; pipeline_mode=pl.Buffered(1) can halve it further.)
    resident = lambda shape: pl.BlockSpec(shape, lambda i: (0, 0))

    wbytes = prep["w2"].dtype.itemsize
    cost = pl.CostEstimate(
        flops=2 * BP * H * (n_obs + n_act + H) + 2 * BP * H,
        transcendentals=0,
        bytes_accessed=(sp.dtype.itemsize * BP * (n_obs + n_act)
                        + wbytes * H * (n_obs + n_act + H)
                        + 4 * (3 * H + 1 + BP)),
    )

    out = pl.pallas_call(
        critic_kernel,
        out_shape=jax.ShapeDtypeStruct((BP, 1), jnp.float32),
        grid=grid,
        in_specs=[
            pl.BlockSpec((TB, n_obs), lambda i: (i, 0)),   # state streams over batch
            pl.BlockSpec((TB, n_act), lambda i: (i, 0)),   # action streams over batch
            resident((n_obs, H)),
            resident((n_act, H)),
            resident((1, H)),
            resident((H, H)),
            resident((1, H)),
            resident((1, H)),
            resident((1, 1)),
        ],
        out_specs=pl.BlockSpec((TB, 1), lambda i: (i, 0)),
        compiler_params=pltpu.CompilerParams(
            dimension_semantics=("parallel",),  # batch axis across v7x's 2 TCs
        ),
        cost_estimate=cost,
    )(sp, ap, prep["w1s"], prep["w1a"], prep["b1"], prep["w2"], prep["b2"],
      prep["w3t"], prep["b3"])

    return out[:batch]


def init_critic_params(key, n_obs, n_actions, hidden_size, init_w=0.003):
    """Mirrors nn.Linear defaults (U[-1/sqrt(fan_in), +1/sqrt(fan_in)]) for
    linear1/2 and the custom uniform(-init_w, init_w) for linear3."""
    k1, k2, k3, k4, k5, k6 = jax.random.split(key, 6)

    def uniform(k, shape, bound):
        return jax.random.uniform(k, shape, jnp.float32, -bound, bound)

    fan1 = n_obs + n_actions
    b_l1 = 1.0 / jnp.sqrt(jnp.float32(fan1))
    b_l2 = 1.0 / jnp.sqrt(jnp.float32(hidden_size))
    return {
        # weights stored as [in, out] (transpose of PyTorch's [out, in])
        "w1": uniform(k1, (fan1, hidden_size), b_l1),
        "b1": uniform(k2, (1, hidden_size), b_l1),
        "w2": uniform(k3, (hidden_size, hidden_size), b_l2),
        "b2": uniform(k4, (1, hidden_size), b_l2),
        "w3": uniform(k5, (hidden_size, 1), init_w),
        "b3": uniform(k6, (1, 1), init_w),
    }


def critic_reference(state, action, p):
    x = jnp.concatenate([state, action], axis=1)
    h1 = jnp.maximum(x @ p["w1"] + p["b1"], 0.0)
    h2 = jnp.maximum(h1 @ p["w2"] + p["b2"], 0.0)
    return h2 @ p["w3"] + p["b3"]


if __name__ == "__main__":
    key = jax.random.PRNGKey(0)
    k_params, k_s, k_a = jax.random.split(key, 3)

    batch, n_obs, n_actions, hidden = 2, 16, 4, 32
    params = init_critic_params(k_params, n_obs, n_actions, hidden)
    state = jax.random.normal(k_s, (batch, n_obs), jnp.float32)
    action = jax.random.normal(k_a, (batch, n_actions), jnp.float32)

    ref = critic_reference(state, action, params)

    # f32 matmul-input path: bit-tight check against the pure-JAX reference.
    prep_f32 = prepare_params(params, n_obs, jnp.float32)
    out = jax.block_until_ready(critic_forward(state, action, prep_f32))
    assert out.shape == (batch, 1), out.shape
    assert jnp.allclose(out, ref, atol=1e-5, rtol=1e-5), "f32 mismatch vs reference"

    # bf16 matmul-input path (full v6e/v7x MXU rate, halved weight/activation
    # DMA) with f32 accumulation + epilogue: loose-tolerance check.
    prep_bf16 = prepare_params(params, n_obs, jnp.bfloat16)
    out_bf16 = jax.block_until_ready(critic_forward(state, action, prep_bf16))
    assert out_bf16.shape == (batch, 1), out_bf16.shape
    assert jnp.allclose(out_bf16, ref, atol=5e-2, rtol=5e-2), "bf16 mismatch vs reference"

    print("KERNEL_OK")
</pallas_src>

<mosaic_0001>
module attributes {stable_mosaic.version = 11 : i64} {
  func.func @critic_kernel(%arg0: i32, %arg1: memref<8x16xf32, #tpu.memory_space<vmem>>, %arg2: memref<8x4xf32, #tpu.memory_space<vmem>>, %arg3: memref<16x128xf32, #tpu.memory_space<vmem>>, %arg4: memref<4x128xf32, #tpu.memory_space<vmem>>, %arg5: memref<1x128xf32, #tpu.memory_space<vmem>>, %arg6: memref<128x128xf32, #tpu.memory_space<vmem>>, %arg7: memref<1x128xf32, #tpu.memory_space<vmem>>, %arg8: memref<1x128xf32, #tpu.memory_space<vmem>>, %arg9: memref<1x1xf32, #tpu.memory_space<vmem>>, %arg10: memref<8x1xf32, #tpu.memory_space<vmem>>) attributes {dimension_semantics = [#tpu.dimension_semantics<parallel>], iteration_bounds = array<i64: 1>, scalar_prefetch = 0 : i64, scratch_operands = 0 : i64, tpu.core_type = #tpu.core_type<tc>, window_params = [{transform_indices = @transform_0, window_bounds = array<i64: 8, 16>}, {transform_indices = @transform_1, window_bounds = array<i64: 8, 4>}, {pipeline_mode = #tpu.pipeline_mode<synchronous>, transform_indices = @transform_2, window_bounds = array<i64: 16, 128>}, {pipeline_mode = #tpu.pipeline_mode<synchronous>, transform_indices = @transform_3, window_bounds = array<i64: 4, 128>}, {pipeline_mode = #tpu.pipeline_mode<synchronous>, transform_indices = @transform_4, window_bounds = array<i64: 1, 128>}, {pipeline_mode = #tpu.pipeline_mode<synchronous>, transform_indices = @transform_5, window_bounds = array<i64: 128, 128>}, {pipeline_mode = #tpu.pipeline_mode<synchronous>, transform_indices = @transform_6, window_bounds = array<i64: 1, 128>}, {pipeline_mode = #tpu.pipeline_mode<synchronous>, transform_indices = @transform_7, window_bounds = array<i64: 1, 128>}, {pipeline_mode = #tpu.pipeline_mode<synchronous>, transform_indices = @transform_8, window_bounds = array<i64: 1, 1>}, {transform_indices = @transform_9, window_bounds = array<i64: 8, 1>}]} {
    %c0 = arith.constant 0 : index
    %c0_0 = arith.constant 0 : index
    %0 = vector.load %arg1[%c0, %c0_0] : memref<8x16xf32, #tpu.memory_space<vmem>>, vector<8x16xf32>
    %c0_1 = arith.constant 0 : index
    %c0_2 = arith.constant 0 : index
    %1 = vector.load %arg3[%c0_1, %c0_2] : memref<16x128xf32, #tpu.memory_space<vmem>>, vector<16x128xf32>
    %cst = arith.constant dense<0.000000e+00> : vector<8x128xf32>
    %2 = tpu.matmul %0, %1, %cst {dimension_numbers = #tpu.dot_dimension_numbers<[1], [0], [0], [1], [0, 0, 1, 1], [], []>} : vector<8x16xf32>, vector<16x128xf32>, vector<8x128xf32> -> vector<8x128xf32>
    %c0_3 = arith.constant 0 : index
    %c0_4 = arith.constant 0 : index
    %3 = vector.load %arg2[%c0_3, %c0_4] : memref<8x4xf32, #tpu.memory_space<vmem>>, vector<8x4xf32>
    %c0_5 = arith.constant 0 : index
    %c0_6 = arith.constant 0 : index
    %4 = vector.load %arg4[%c0_5, %c0_6] : memref<4x128xf32, #tpu.memory_space<vmem>>, vector<4x128xf32>
    %cst_7 = arith.constant dense<0.000000e+00> : vector<8x128xf32>
    %5 = tpu.matmul %3, %4, %cst_7 {dimension_numbers = #tpu.dot_dimension_numbers<[1], [0], [0], [1], [0, 0, 1, 1], [], []>} : vector<8x4xf32>, vector<4x128xf32>, vector<8x128xf32> -> vector<8x128xf32>
    %6 = arith.addf %2, %5 : vector<8x128xf32>
    %c0_8 = arith.constant 0 : index
    %c0_9 = arith.constant 0 : index
    %7 = vector.load %arg5[%c0_8, %c0_9] : memref<1x128xf32, #tpu.memory_space<vmem>>, vector<1x128xf32>
    %8 = vector.broadcast %7 : vector<1x128xf32> to vector<8x128xf32>
    %9 = arith.addf %6, %8 : vector<8x128xf32>
    %cst_10 = arith.constant 0.000000e+00 : f32
    %10 = vector.broadcast %cst_10 : f32 to vector<8x128xf32>
    %11 = arith.maximumf %9, %10 : vector<8x128xf32>
    %c0_11 = arith.constant 0 : index
    %c0_12 = arith.constant 0 : index
    %12 = vector.load %arg6[%c0_11, %c0_12] : memref<128x128xf32, #tpu.memory_space<vmem>>, vector<128x128xf32>
    %cst_13 = arith.constant dense<0.000000e+00> : vector<8x128xf32>
    %13 = tpu.matmul %11, %12, %cst_13 {dimension_numbers = #tpu.dot_dimension_numbers<[1], [0], [0], [1], [0, 0, 1, 1], [], []>} : vector<8x128xf32>, vector<128x128xf32>, vector<8x128xf32> -> vector<8x128xf32>
    %c0_14 = arith.constant 0 : index
    %c0_15 = arith.constant 0 : index
    %14 = vector.load %arg7[%c0_14, %c0_15] : memref<1x128xf32, #tpu.memory_space<vmem>>, vector<1x128xf32>
    %15 = vector.broadcast %14 : vector<1x128xf32> to vector<8x128xf32>
    %16 = arith.addf %13, %15 : vector<8x128xf32>
    %cst_16 = arith.constant 0.000000e+00 : f32
    %17 = vector.broadcast %cst_16 : f32 to vector<8x128xf32>
    %18 = arith.maximumf %16, %17 : vector<8x128xf32>
    %c0_17 = arith.constant 0 : index
    %c0_18 = arith.constant 0 : index
    %19 = vector.load %arg8[%c0_17, %c0_18] : memref<1x128xf32, #tpu.memory_space<vmem>>, vector<1x128xf32>
    %20 = vector.broadcast %19 : vector<1x128xf32> to vector<8x128xf32>
    %21 = arith.mulf %18, %20 : vector<8x128xf32>
    %cst_19 = arith.constant dense<0.000000e+00> : vector<8xf32>
    %22 = vector.multi_reduction <add>, %21, %cst_19 [1] : vector<8x128xf32> to vector<8xf32>
    %23 = vector.shape_cast %22 : vector<8xf32> to vector<8x1xf32>
    %c0_20 = arith.constant 0 : index
    %c0_21 = arith.constant 0 : index
    %24 = vector.load %arg9[%c0_20, %c0_21] : memref<1x1xf32, #tpu.memory_space<vmem>>, vector<1x1xf32>
    %25 = vector.broadcast %24 : vector<1x1xf32> to vector<8x1xf32>
    %26 = arith.addf %23, %25 : vector<8x1xf32>
    %c0_22 = arith.constant 0 : index
    %c0_23 = arith.constant 0 : index
    %27 = vector.load %arg10[%c0_22, %c0_23] : memref<8x1xf32, #tpu.memory_space<vmem>>, vector<8x1xf32>
    tpu.vector_store %arg10[%c0_22, %c0_23], %26 {strides = array<i32>} : memref<8x1xf32, #tpu.memory_space<vmem>>, vector<8x1xf32>,
    return
  }
  func.func @transform_0(%arg0: i32) -> (i32, i32) {
    %c0_i32 = arith.constant 0 : i32
    %c0_i32_0 = arith.constant 0 : i32
    return %arg0, %c0_i32 : i32, i32
  }
  func.func @transform_1(%arg0: i32) -> (i32, i32) {
    %c0_i32 = arith.constant 0 : i32
    %c0_i32_0 = arith.constant 0 : i32
    return %arg0, %c0_i32 : i32, i32
  }
  func.func @transform_2(%arg0: i32) -> (i32, i32) {
    %c0_i32 = arith.constant 0 : i32
    %c0_i32_0 = arith.constant 0 : i32
    %c0_i32_1 = arith.constant 0 : i32
    return %c0_i32, %c0_i32_0 : i32, i32
  }
  func.func @transform_3(%arg0: i32) -> (i32, i32) {
    %c0_i32 = arith.constant 0 : i32
    %c0_i32_0 = arith.constant 0 : i32
    %c0_i32_1 = arith.constant 0 : i32
    return %c0_i32, %c0_i32_0 : i32, i32
  }
  func.func @transform_4(%arg0: i32) -> (i32, i32) {
    %c0_i32 = arith.constant 0 : i32
    %c0_i32_0 = arith.constant 0 : i32
    %c0_i32_1 = arith.constant 0 : i32
    return %c0_i32, %c0_i32_0 : i32, i32
  }
  func.func @transform_5(%arg0: i32) -> (i32, i32) {
    %c0_i32 = arith.constant 0 : i32
    %c0_i32_0 = arith.constant 0 : i32
    %c0_i32_1 = arith.constant 0 : i32
    return %c0_i32, %c0_i32_0 : i32, i32
  }
  func.func @transform_6(%arg0: i32) -> (i32, i32) {
    %c0_i32 = arith.constant 0 : i32
    %c0_i32_0 = arith.constant 0 : i32
    %c0_i32_1 = arith.constant 0 : i32
    return %c0_i32, %c0_i32_0 : i32, i32
  }
  func.func @transform_7(%arg0: i32) -> (i32, i32) {
    %c0_i32 = arith.constant 0 : i32
    %c0_i32_0 = arith.constant 0 : i32
    %c0_i32_1 = arith.constant 0 : i32
    return %c0_i32, %c0_i32_0 : i32, i32
  }
  func.func @transform_8(%arg0: i32) -> (i32, i32) {
    %c0_i32 = arith.constant 0 : i32
    %c0_i32_0 = arith.constant 0 : i32
    %c0_i32_1 = arith.constant 0 : i32
    return %c0_i32, %c0_i32_0 : i32, i32
  }
  func.func @transform_9(%arg0: i32) -> (i32, i32) {
    %c0_i32 = arith.constant 0 : i32
    %c0_i32_0 = arith.constant 0 : i32
    return %arg0, %c0_i32 : i32, i32
  }
}

</mosaic_0001>

<bundles_post_ra>
// kernel: tpu_custom_call.1
= control target key start
LH: loop header
LB: loop body
LE: loop exit
PB: predicated region body
PF: predicated region fallthrough
CT: control target
= control target key end

     0   :  { %s622_s0 = inlined_call_operand.hbm [shape: f32[8,16], index: 0, kind: input, shape index: {}]   ;;  %s623_s1 = inlined_call_operand.vmem [shape: f32[8,4], index: 1, kind: input, shape index: {}]   ;;  %s624_s2 = inlined_call_operand.vmem [shape: f32[16,128], index: 2, kind: input, shape index: {}]   ;;  %s625_s3 = inlined_call_operand.vmem [shape: f32[4,128], index: 3, kind: input, shape index: {}]   ;;  %s626_s4 = inlined_call_operand.vmem [shape: f32[1,128], index: 4, kind: input, shape index: {}]   ;;  %s627_s5 = inlined_call_operand.hbm [shape: f32[128,128], index: 5, kind: input, shape index: {}]   ;;  %s628_s6 = inlined_call_operand.vmem [shape: f32[1,128], index: 6, kind: input, shape index: {}]   ;;  %s629_s7 = inlined_call_operand.vmem [shape: f32[1,128], index: 7, kind: input, shape index: {}]   ;;  %s630_s8 = inlined_call_operand.<no memory space> [shape: f32[1,1], index: 8, kind: input, shape index: {}]   ;;  %s631_s9 = inlined_call_operand.vmem [shape: f32[8,1], index: 9, kind: output, shape index: {}]  }
   0x1   :  { %v14_v0 = vstv %s630_s8 }
   0x2   :  { %15 = vst [vmem:[#allocation2] sm:$0x1] %v14_v0 }
   0x3   :  { %16 = vsyncpa [#allocation4], 0 }
   0x4   :  { %17 = vsyncpa [#allocation6], 0  ;;  %s504_s11 = smov [#allocation3]   ;;  %s505_s13 = smov [#allocation5]  }
   0x5   :  { %s24_s12 = sshll.u32 %s504_s11, 4  ;;  %s41_s14 = sshll.u32 %s505_s13, 4  ;;  %s25_s12 = int_to_ptr.vmem [resolvable:$true] %s24_s12  ;;  %s564_s14 = int_to_ptr.vmem [resolvable:$true] %s41_s14 }
   0x6   :  { %s456_s17 = scalar_lea.hbm %s622_s0, 128 }
   0x7   :  { %p457_p0 = scmp.ne.s32.totalorder %s622_s0, %s456_s17  ;;  %p460_p1 = scmp.lt.u32.totalorder %s456_s17, %s622_s0 }
   0x9   :  { %p462_p2 = pnand %p460_p1, %p457_p0 }
   0xb   :  { %465 = shalt.err (!%p462_p2)
}
   0xc   :  { %s466_s21 = scalar_lea.vmem %s25_s12, 128  ;;  %p471_p4 = scmp.lt.s32.totalorder %s25_s12, %s25_s12 }
   0xd   :  { %p467_p3 = scmp.ne.s32.totalorder %s25_s12, %s466_s21  ;;  %p472_p5 = scmp.lt.s32.totalorder %s466_s21, %s466_s21 }
   0xf   :  { %p473_p6 = por %p472_p5, %p471_p4 }
  0x11   :  { %p474_p7 = pnand %p473_p6, %p467_p3 }
  0x13   :  { %477 = shalt.err (!%p474_p7)
}
  0x14   :  { %27 = dma.hbm_to_vmem [thread:$0]  %s622_s0, 128, %s25_s12, [#allocation4]  }
  0x15   :  { %s478_s26 = scalar_lea.hbm %s627_s5, 2048 }
  0x16   :  { %p479_p8 = scmp.ne.s32.totalorder %s627_s5, %s478_s26  ;;  %p482_p9 = scmp.lt.u32.totalorder %s478_s26, %s627_s5 }
  0x18   :  { %p484_p10 = pnand %p482_p9, %p479_p8 }
  0x1a   :  { %487 = shalt.err (!%p484_p10)
}
  0x1b   :  { %s488_s10 = scalar_lea.vmem %s564_s14, 2048  ;;  %p493_p12 = scmp.lt.s32.totalorder %s564_s14, %s564_s14 }
  0x1c   :  { %p489_p11 = scmp.ne.s32.totalorder %s564_s14, %s488_s10  ;;  %p494_p13 = scmp.lt.s32.totalorder %s488_s10, %s488_s10 }
  0x1e   :  { %p495_p0 = por %p494_p13, %p493_p12 }
  0x20   :  { %p496_p1 = pnand %p495_p0, %p489_p11 }
  0x22   :  { %499 = shalt.err (!%p496_p1)
}
  0x23   :  { %s506_s0 = smov 128   ;;  %s507_s11 = smov 8  }
  0x24   :  { %47 = dma.hbm_to_vmem [thread:$0]  %s627_s5, 2048, %s564_s14, [#allocation6], %s506_s0, %s506_s0, %s507_s11  }
  0x25   :  { %500 = dma.done.wait [#allocation4], 128  }
  0x26   :  { %501 = vsyncadd [#allocation4], 4294967168 }
  0x27   :  { %502 = dma.done.wait [#allocation6], 2048  }
  0x28   :  { %503 = vsyncadd [#allocation6], 4294965248  ;;  %v508_v1 = vmov 0.0   ;;  %vm509_vm0 = vmmov 0   ;;  %v510_v2 = vmov 0.0|0.0   ;;  %vm69_vm1 = vcmask 1043456  }
  0x29   :  { %375 = vmatprep.subr.mxu1 %v508_v1  ;;  %377 = vmatprep.mubr.msk.f32.mxu1 %vm509_vm0, %v508_v1  ;;  %vm65_vm2 = vcmask 31744   ;;  %v64_v3 = vld [vmem:[%s625_s3] sm:$0xf]  ;;  %v62_v6 = vld [vmem:[%s624_s2 + $0x8] sm:$0xff]  ;;  %v227_v9 = vld [vmem:[#allocation5 + $0x8] sm:$0xff]  ;;  %vm143_vm3 = vcmask 130048  }
  0x2a   :  { %425 = vmatprep.subr.bf16.mxu0 %v510_v2  ;;  %419 = vmatprep.mubr.msk.f32.mxu0 %vm509_vm0, %v508_v1  ;;  %v63_v4 = vld [vmem:[%s623_s1] sm:$0xff]  ;;  %v226_v7 = vld [vmem:[#allocation5] sm:$0xff]  ;;  %v231_v16 = vld [vmem:[#allocation5 + $0x28] sm:$0xff]  ;;  %vm338_vm4 = vcmask 7168  }
  0x2b   :  { %v61_v5 = vld [vmem:[%s624_s2] sm:$0xff]  ;;  %376 = vmatpush3.msk.msra.mxu1 %vm69_vm1, %v64_v3  ;;  %v426_v12 = vpack.c.bf16 %v227_v9, %v226_v7  ;;  %v230_v15 = vld [vmem:[#allocation5 + $0x20] sm:$0xff]  ;;  %v235_v22 = vld [vmem:[#allocation5 + $0x48] sm:$0xff] }
  0x2c   :  { %378 = vmatmul.mubr.msk.f32.vlgmr.msra.gmra.mrb[0].mxu1 %vm65_vm2, %v63_v4  ;;  %422 = vmatprep.subr.bf16.mxu1 %v510_v2  ;;  %v423_v8 = vpack.c.bf16 %v62_v6, %v61_v5  ;;  %v228_v10 = vld [vmem:[#allocation5 + $0x10] sm:$0xff]  ;;  %v229_v11 = vld [vmem:[#allocation5 + $0x18] sm:$0xff]  ;;  %v432_v17 = vpack.c.bf16 %v231_v16, %v230_v15  ;;  %v234_v21 = vld [vmem:[#allocation5 + $0x40] sm:$0xff] }
  0x2d   :  { %384 = vmatprep.mubr.msk.f32.mxu1 %vm509_vm0, %v508_v1  ;;  %v60_v13 = vld [vmem:[#allocation3] sm:$0xff]  ;;  %427 = vmatpush3.bf16.msra.mxu0 %v426_v12  ;;  %v429_v14 = vpack.c.bf16 %v229_v11, %v228_v10  ;;  %v232_v18 = vld [vmem:[#allocation5 + $0x30] sm:$0xff]  ;;  %v438_v23 = vpack.c.bf16 %v235_v22, %v234_v21  ;;  %v238_v27 = vld [vmem:[#allocation5 + $0x60] sm:$0xff] }
  0x2e   :  { %424 = vmatpush3.bf16.msra.mxu1 %v423_v8  ;;  %428 = vmatprep.subr.bf16.mxu0 %v510_v2  ;;  %v233_v19 = vld [vmem:[#allocation5 + $0x38] sm:$0xff]  ;;  %v236_v24 = vld [vmem:[#allocation5 + $0x50] sm:$0xff]  ;;  %v239_v28 = vld [vmem:[#allocation5 + $0x68] sm:$0xff] }
  0x2f   :  { %v435_v20 = vpack.c.bf16 %v233_v19, %v232_v18  ;;  %v237_v25 = vld [vmem:[#allocation5 + $0x58] sm:$0xff]  ;;  %v444_v29 = vpack.c.bf16 %v239_v28, %v238_v27  ;;  %v240_v30 = vld [vmem:[#allocation5 + $0x70] sm:$0xff] }
  0x30   :  { %v441_v26 = vpack.c.bf16 %v237_v25, %v236_v24  ;;  %v241_v31 = vld [vmem:[#allocation5 + $0x78] sm:$0xff]  ;;  %v349_v36 = vld [vmem:[%s626_s4] ss:$0 sm:$0xff] }
  0x31   :  { %385 = vmatmul.mubr.msk.f32.vlgmr.msra.gmra.mrb[2].mxu1 %vm143_vm3, %v60_v13  ;;  %430 = vmatpush3.bf16.msra.mxu0 %v429_v14  ;;  %v447_v32 = vpack.c.bf16 %v241_v31, %v240_v30  ;;  %v350_v41 = vld [vmem:[%s628_s6] ss:$0 sm:$0xff] }
  0x32   :  { %431 = vmatprep.subr.bf16.mxu0 %v510_v2  ;;  %v351_v45 = vld [vmem:[%s629_s7] ss:$0 sm:$0xff] }
  0x33   :  { %v352_v48 = vld [vmem:[#allocation2] ss:$0 sm:$0xff] }
  0x35   :  { %433 = vmatpush3.bf16.msra.mxu0 %v432_v17 }
  0x36   :  { %434 = vmatprep.subr.bf16.mxu0 %v510_v2 }
  0x39   :  { %436 = vmatpush3.bf16.msra.mxu0 %v435_v20 }
  0x3a   :  { %437 = vmatprep.subr.bf16.mxu0 %v510_v2 }
  0x3d   :  { %439 = vmatpush3.bf16.msra.mxu0 %v438_v23 }
  0x3e   :  { %440 = vmatprep.subr.bf16.mxu0 %v510_v2 }
  0x41   :  { %442 = vmatpush3.bf16.msra.mxu0 %v441_v26 }
  0x42   :  { %443 = vmatprep.subr.bf16.mxu0 %v510_v2 }
  0x45   :  { %445 = vmatpush3.bf16.msra.mxu0 %v444_v29 }
  0x46   :  { %446 = vmatprep.subr.bf16.mxu0 %v510_v2 }
  0x49   :  { %448 = vmatpush3.bf16.msra.mxu0 %v447_v32 }
  0xff   :  { %v139_v33 = vpop.f32.mrb[0].mxu1 }
 0x100   :  { %v379_v34 = vpop.f32.mrb[1].mxu1 }
 0x104   :  { %v213_v35 = vpop.f32.mrb[2].mxu1 }
 0x105   :  { %v214_v37 = vadd.f32 %v213_v35, %v139_v33  ;;  %v386_v38 = vpop.f32.mrb[3].mxu1 }
 0x107   :  { %v224_v39 = vadd.f32 %v349_v36, %v214_v37 }
 0x109   :  { %v225_v40 = vmax.f32 %v224_v39, 0.0 }
 0x10b   :  { %420 = vmatmul.mubr.f32.vlgmr.msra.gmra.mrb[0].mxu0 %v225_v40 }
 0x1de   :  { %v315_v42 = vpop.f32.mrb[0].mxu0 }
 0x1df   :  { %v316_v43 = vadd.f32 %v350_v41, %v315_v42  ;;  %v421_v44 = vpop.f32.mrb[1].mxu0 }
 0x1e1   :  { %v319_v46 = vmax.f32 %v316_v43, 0.0 }
 0x1e3   :  { %v327_v47 = vmul.f32 %v351_v45, %v319_v46 }
 0x1e5   :  { %328 = vadd.xlane.f32.xlu0 %v327_v47 }
 0x272   :  { %v329_v49 = vpop.xlane.xlu0 %328 }
 0x273   :  { %v337_v50 = vadd.f32 %v352_v48, %v329_v49 }
 0x275   :  { %339 = vst.msk [vmem:[%s631_s9] sm:$0xff] %vm338_vm4, %v337_v50 }
 0x276   :  { %344 = vsyncpa [#allocation4], 1 }
 0x277   :  { %345 = vsyncpa [#allocation6], 1 }

</bundles_post_ra>
